<compile_context>
chip_gen: v5e
topology: v5e:2x2
jax: 0.10.0
libtpu: 0.0.40
codegen_flags: <defaults>
</compile_context>

<pallas_src>
from typing import Any, Callable

import jax
import jax.numpy as jnp
from jax.experimental import pallas as pl
from jax.experimental.pallas import tpu as pltpu


def _round_up(n: int, m: int) -> int:
    return ((n + m - 1) // m) * m


# ----------------------------------------------------------------------------
# Pallas kernels
# ----------------------------------------------------------------------------
def _linear_kernel_fused(x_ref, w_ref, b_ref, o_ref):
    """Single K step: out_tile = x_tile @ w_tile + b_tile (no accumulator)."""
    x = x_ref[...].astype(jnp.bfloat16)  # in-kernel cast, overlapped with DMA
    o_ref[...] = (
        jnp.dot(x, w_ref[...], preferred_element_type=jnp.float32) + b_ref[...]
    ).astype(o_ref.dtype)


def _linear_kernel_acc(x_ref, w_ref, b_ref, o_ref, acc_ref):
    """Multi K step: f32 VMEM accumulator, bias folded into the init."""
    k = pl.program_id(2)

    @pl.when(k == 0)
    def _init():
        acc_ref[...] = jnp.broadcast_to(b_ref[...], acc_ref.shape).astype(
            jnp.float32
        )

    acc_ref[...] += jnp.dot(
        x_ref[...].astype(jnp.bfloat16),
        w_ref[...],
        preferred_element_type=jnp.float32,
    )

    @pl.when(k == pl.num_programs(2) - 1)
    def _finalize():
        o_ref[...] = acc_ref[...].astype(o_ref.dtype)


# ----------------------------------------------------------------------------
# Wrapper around pallas_call
# ----------------------------------------------------------------------------
def pallas_linear(x: jax.Array, w_padded: jax.Array, b_padded: jax.Array,
                  n_logical: int) -> jax.Array:
    """x: (B, K) f32; w_padded: (Kp, Np) bf16; b_padded: (1, Np) f32.

    Returns (B, n_logical) f32.  Weight / bias are already padded & cast at
    module init; only x is (optionally) padded here.
    """
    B, K = x.shape
    Kp, Np = w_padded.shape
    assert b_padded.shape == (1, Np)
    assert K <= Kp

    # --- tile selection -----------------------------------------------------
    if B <= 512:
        tm = _round_up(B, 8)          # whole M in one block: W read once
    else:
        tm = 256
    tn = 512 if (Np % 512 == 0 and Np // 512 >= 2) else 256
    if Kp <= 1024:
        tk = Kp                       # single K step -> fused kernel
    else:
        tk = 512 if Kp % 512 == 0 else 256

    Bp = _round_up(B, tm)

    # --- pad x only if needed (static shape check) --------------------------
    if (Bp != B) or (Kp != K):
        x_in = jnp.zeros((Bp, Kp), x.dtype).at[:B, :K].set(x)
    else:
        x_in = x

    n_m, n_n, n_k = Bp // tm, Np // tn, Kp // tk
    grid = (n_m, n_n, n_k)

    single_k = n_k == 1
    kernel = _linear_kernel_fused if single_k else _linear_kernel_acc
    scratch = [] if single_k else [pltpu.VMEM((tm, tn), jnp.float32)]

    out_bytes = Bp * Np * 4
    cost = pl.CostEstimate(
        flops=2 * Bp * Kp * Np,
        transcendentals=0,
        bytes_accessed=x_in.size * 4 + w_padded.size * 2
        + b_padded.size * 4 + out_bytes,
    )

    out_padded = pl.pallas_call(
        kernel,
        out_shape=jax.ShapeDtypeStruct((Bp, Np), jnp.float32),
        grid_spec=pltpu.PrefetchScalarGridSpec(
            num_scalar_prefetch=0,
            grid=grid,
            in_specs=[
                pl.BlockSpec((tm, tk), lambda i, j, k: (i, k)),   # x tile (f32)
                pl.BlockSpec((tk, tn), lambda i, j, k: (k, j)),   # W tile (bf16)
                pl.BlockSpec((1, tn), lambda i, j, k: (0, j)),    # bias tile
            ],
            out_specs=pl.BlockSpec((tm, tn), lambda i, j, k: (i, j)),
            scratch_shapes=scratch,
        ),
        compiler_params=pltpu.CompilerParams(
            dimension_semantics=("parallel", "parallel", "arbitrary"),
            vmem_limit_bytes=48 * 1024 * 1024,  # under v7x's 64 MiB physical VMEM
        ),
        cost_estimate=cost,
    )(x_in, w_padded, b_padded)

    # Slice padding off only when padding was actually introduced.
    if (Bp != B) or (Np != n_logical):
        return out_padded[:B, :n_logical]
    return out_padded


# ----------------------------------------------------------------------------
# Inner "module": a Linear layer whose forward runs the Pallas kernel
# ----------------------------------------------------------------------------
class InnerLinearModule:
    """Stands in for the wrapped nn.Module (here: nn.Linear(IN, OUT))."""

    def __init__(self, in_features: int, out_features: int, key: jax.Array):
        kw, kb = jax.random.split(key)
        bound = 1.0 / (in_features ** 0.5)
        # Logical f32 parameters (kept for reference / state_dict parity).
        self.weight_t = jax.random.uniform(
            kw, (in_features, out_features), jnp.float32, -bound, bound
        )  # stored pre-transposed: (IN, OUT)
        self.bias = jax.random.uniform(
            kb, (1, out_features), jnp.float32, -bound, bound
        )
        self.out_features = out_features

        # Pre-pad + pre-cast ONCE (done at init, not per forward).
        Kp = _round_up(in_features, 256)
        Np = _round_up(out_features, 256)
        self.w_padded = (
            jnp.zeros((Kp, Np), jnp.bfloat16)
            .at[:in_features, :out_features]
            .set(self.weight_t.astype(jnp.bfloat16))
        )
        self.b_padded = (
            jnp.zeros((1, Np), jnp.float32).at[:, :out_features].set(self.bias)
        )

    def __call__(self, x: jax.Array) -> jax.Array:
        return pallas_linear(x, self.w_padded, self.b_padded, self.out_features)


# ----------------------------------------------------------------------------
# The module under translation: forward = new_forward(inner_module, *args)
# ----------------------------------------------------------------------------
class ReplaceForwardModule:
    """JAX equivalent of `_ReplaceForwardModule`: pure call delegation."""

    def __init__(self, module: Any, new_forward: Callable):
        self._inner_module = module
        self.new_forward = new_forward

    def forward(self, *args, **kwargs):
        return self.new_forward(self._inner_module, *args, **kwargs)

    __call__ = forward


# The replacement forward that the wrapper dispatches to.
def new_forward(module: InnerLinearModule, x: jax.Array) -> jax.Array:
    return module(x)


if __name__ == "__main__":
    # Small, tile-aligned shapes: no padding path, single K step,
    # 2 N-blocks on the megacore "parallel" axis.
    B, IN, OUT = 128, 256, 512

    key = jax.random.PRNGKey(0)
    k_param, k_x = jax.random.split(key)

    inner = InnerLinearModule(IN, OUT, k_param)
    wrapped = ReplaceForwardModule(inner, new_forward)

    x = jax.random.normal(k_x, (B, IN), jnp.float32)

    fwd = jax.jit(wrapped.forward)
    out = jax.block_until_ready(fwd(x))

    # Reference: same bf16-rounded operands, f32 accumulation, f32 bias.
    # TODO(synk): results are bf16-MXU precision; switch operands to f32 if
    # bit-exact parity with a true f32 PyTorch nn.Linear is required.
    x_bf = x.astype(jnp.bfloat16).astype(jnp.float32)
    w_bf = inner.weight_t.astype(jnp.bfloat16).astype(jnp.float32)
    ref = x_bf @ w_bf + inner.bias

    assert out.shape == (B, OUT)
    assert jnp.allclose(out, ref, atol=1e-3, rtol=1e-3)

    print("KERNEL_OK")
</pallas_src>

<mosaic_0001>
module attributes {stable_mosaic.version = 11 : i64} {
  func.func @_linear_kernel_fused(%arg0: i32, %arg1: i32, %arg2: i32, %arg3: memref<128x256xf32, #tpu.memory_space<vmem>>, %arg4: memref<256x256xbf16, #tpu.memory_space<vmem>>, %arg5: memref<1x256xf32, #tpu.memory_space<vmem>>, %arg6: memref<128x256xf32, #tpu.memory_space<vmem>>) attributes {dimension_semantics = [#tpu.dimension_semantics<parallel>, #tpu.dimension_semantics<parallel>, #tpu.dimension_semantics<arbitrary>], iteration_bounds = array<i64: 1, 2, 1>, scalar_prefetch = 0 : i64, scratch_operands = 0 : i64, tpu.core_type = #tpu.core_type<tc>, window_params = [{transform_indices = @transform_0, window_bounds = array<i64: 128, 256>}, {transform_indices = @transform_1, window_bounds = array<i64: 256, 256>}, {transform_indices = @transform_2, window_bounds = array<i64: 1, 256>}, {transform_indices = @transform_3, window_bounds = array<i64: 128, 256>}]} {
    %c0 = arith.constant 0 : index
    %c0_0 = arith.constant 0 : index
    %0 = vector.load %arg3[%c0, %c0_0] : memref<128x256xf32, #tpu.memory_space<vmem>>, vector<128x256xf32>
    %1 = arith.truncf %0 : vector<128x256xf32> to vector<128x256xbf16>
    %c0_1 = arith.constant 0 : index
    %c0_2 = arith.constant 0 : index
    %2 = vector.load %arg4[%c0_1, %c0_2] : memref<256x256xbf16, #tpu.memory_space<vmem>>, vector<256x256xbf16>
    %cst = arith.constant dense<0.000000e+00> : vector<128x256xf32>
    %3 = tpu.matmul %1, %2, %cst {dimension_numbers = #tpu.dot_dimension_numbers<[1], [0], [0], [1], [0, 0, 1, 1], [], []>} : vector<128x256xbf16>, vector<256x256xbf16>, vector<128x256xf32> -> vector<128x256xf32>
    %c0_3 = arith.constant 0 : index
    %c0_4 = arith.constant 0 : index
    %4 = vector.load %arg5[%c0_3, %c0_4] : memref<1x256xf32, #tpu.memory_space<vmem>>, vector<1x256xf32>
    %5 = vector.broadcast %4 : vector<1x256xf32> to vector<128x256xf32>
    %6 = arith.addf %3, %5 : vector<128x256xf32>
    %c0_5 = arith.constant 0 : index
    %c0_6 = arith.constant 0 : index
    %7 = vector.load %arg6[%c0_5, %c0_6] : memref<128x256xf32, #tpu.memory_space<vmem>>, vector<128x256xf32>
    tpu.vector_store %arg6[%c0_5, %c0_6], %6 {strides = array<i32>} : memref<128x256xf32, #tpu.memory_space<vmem>>, vector<128x256xf32>,
    return
  }
  func.func @transform_0(%arg0: i32, %arg1: i32, %arg2: i32) -> (i32, i32) {
    %c0_i32 = arith.constant 0 : i32
    return %arg0, %arg2 : i32, i32
  }
  func.func @transform_1(%arg0: i32, %arg1: i32, %arg2: i32) -> (i32, i32) {
    %c0_i32 = arith.constant 0 : i32
    return %arg2, %arg1 : i32, i32
  }
  func.func @transform_2(%arg0: i32, %arg1: i32, %arg2: i32) -> (i32, i32) {
    %c0_i32 = arith.constant 0 : i32
    %c0_i32_0 = arith.constant 0 : i32
    return %c0_i32, %arg1 : i32, i32
  }
  func.func @transform_3(%arg0: i32, %arg1: i32, %arg2: i32) -> (i32, i32) {
    %c0_i32 = arith.constant 0 : i32
    return %arg0, %arg1 : i32, i32
  }
}

</mosaic_0001>

<bundles_post_ra>
// kernel: forward.1
= control target key start
LH: loop header
LB: loop body
LE: loop exit
PB: predicated region body
PF: predicated region fallthrough
CT: control target
= control target key end

     0   :  { %s1700_s0 = inlined_call_operand.hbm [shape: f32[128,256], index: 0, kind: input, shape index: {}]   ;;  %s1701_s1 = inlined_call_operand.hbm [shape: bf16[256,512], index: 1, kind: input, shape index: {}]   ;;  %s1702_s2 = inlined_call_operand.hbm [shape: f32[1,512], index: 2, kind: input, shape index: {}]   ;;  %s1703_s3 = inlined_call_operand.hbm [shape: f32[128,512], index: 3, kind: output, shape index: {}]  }
   0x1   :  { %1705 = sst [smem:[#allocation12_spill]] %s1700_s0 }
   0x2   :  { %1706 = sst [smem:[#allocation13_spill]] %s1701_s1 }
   0x3   :  { %8 = vsyncpa [#allocation3], 0 }
   0x4   :  { %9 = vsyncpa [#allocation6], 0 }
   0x5   :  { %11 = vsyncpa [#allocation6 + $0x1], 0 }
   0x6   :  { %12 = vsyncpa [#allocation4], 0 }
   0x7   :  { %14 = vsyncpa [#allocation4 + $0x1], 0  ;;  %s1383_s12 = smov 0   ;;  %s1385_s13 = smov 0  }
   0x8   :  { %s1387_s14 = smov 0   ;;  %s1389_s15 = smov 0  }
   0x9   :  { %s1391_s16 = smov 0   ;;  %s1393_s17 = smov 0  }
   0xa LB: > { %s35_s18 = sadd.s32 1, %s1349_s16  ;;  %s76_s19 = sadd.s32 1, %s1341_s14  ;;  %s1353_s17 = sphi %s1393_s17, %s20_s17   ;;  %s1349_s16 = sphi %s1391_s16, %s1720_s16   ;;  %s1345_s15 = sphi %s1389_s15, %s1719_s15   ;;  %s1341_s14 = sphi %s1387_s14, %s1718_s14   ;;  %s1337_s13 = sphi %s1385_s13, %s1717_s13   ;;  %s1333_s12 = sphi %s1383_s12, %s1716_s12  }
   0xb   : > { %p37_p0 = scmp.ge.s32.totalorder %s35_s18, 2  ;;  %p83_p1 = scmp.ne.s32.totalorder %s1341_s14, %s1337_s13 }
   0xc   : > { %p84_p2 = scmp.eq.s32.totalorder %s1353_s17, 0  ;;  %p914_p4 = scmp.ge.s32.totalorder %s1353_s17, 2 }
   0xd   : > { %s1722_s18 = smov (%p37_p0, %s35_s18), 0  ;;  %p1118_p5 = scmp.lt.s32.totalorder %s1353_s17, 2 }
   0xe   : > { %p1423_p3 = por %p84_p2, %p83_p1  ;;  %s72_s21 = ssub.s32 %s1349_s16, %s1722_s18 }
   0xf   : > { %p74_p6 = scmp.eq.s32.totalorder %s72_s21, 0  ;;  %s187_s22 = sand.u32 1, %s1353_s17  }
  0x10   : > { %s189_s23 = sand.u32 1, %s1341_s14   ;;  %s1058_s26 = sshll.u32 %s1349_s16, 3 }
  0x11   : > { %s1434_s24 = scalar_select %p74_p6, %s1341_s14, %s76_s19  }
  0x12   : > { %s915_s25 = sshll.u32 %s189_s23, 8  ;;  %s1708_s1 = sld [smem:[#allocation13_spill]] }
  0x13   : > { %s191_s4 = scalar_lea.vmem [#allocation5], %s915_s25  ;;  %p1446_p7 = pnand %p1118_p5, %p1423_p3 }
  0x14   : > { %s202_s5 = sshll.u32 %s191_s4, 4  ;;  %s1450_s7 = scalar_lea.sflag [#allocation6], %s187_s22  ;;  %s203_s5 = int_to_ptr.vmem [resolvable:$true] %s202_s5 }
  0x15   : > { %s1704_s8 = smov 256   ;;  %s1356_s9 = smov 128  }
  0x16   : > { %s1357_s10 = smov 8   ;;  %s1457_s11 = sadd.s32 4294967295, %s1353_s17  }
  0x17   : > { %s911_s19 = sadd.s32 4294967294, %s1353_s17   ;;  %p89_p8 = scmp.ne.s32.totalorder %s1337_s13, %s1333_s12 }
  0x18   : > { %s199_s29 = scalar_lea.hbm %s1708_s1, %s1058_s26  ;;  %p90_p9 = scmp.eq.s32.totalorder %s1457_s11, 0 }
  0x19   : > { %s200_s30 = sshll.u32 %s199_s29, 4  ;;  %p141_p10 = scmp.eq.s32.totalorder %s1457_s11, 1  ;;  %s201_s30 = int_to_ptr.hbm [resolvable:$true] %s200_s30 }
  0x1a   : > { %1109 = dma.hbm_to_vmem [thread:$0]  (!%p1446_p7), %s201_s30, 4096, %s203_s5, %s1450_s7, %s1704_s8, %s1356_s9, %s1357_s10  }
  0x1b   : > { %p147_p11 = scmp.eq.s32.totalorder %s911_s19, 1  ;;  %p1466_p12 = por %p90_p9, %p89_p8 }
  0x1c   : > { %p912_p13 = scmp.ge.s32.totalorder %s1353_s17, 1  ;;  %p1474_p0 = por %p141_p10, %p83_p1 }
  0x1d   : > { %p1478_p2 = por %p147_p11, %p89_p8  ;;  %p154_p3 = scmp.lt.s32.totalorder %s1353_s17, 3 }
  0x1e   : > { %s1713_s0 = sld [smem:[#allocation12_spill]]  ;;  %s1358_s29 = smov [#allocation2]  }
  0x1f   : > { %p1486_p5 = pnand %p912_p13, %p154_p3  ;;  %s173_s30 = sshll.u32 %s1358_s29, 4  ;;  %s174_s30 = int_to_ptr.vmem [resolvable:$true] %s173_s30 }
  0x20   : > { %s918_s4 = sshll.u32 %s189_s23, 1  ;;  %s919_s5 = sshll.u32 %s1349_s16, 1 }
  0x21   : > { %p1102_p1 = pneg %p1486_p5  ;;  %s220_s19 = scalar_lea.hbm %s1702_s2, %s919_s5 }
  0x22   : > { %s216_s25 = scalar_lea.vmem [#allocation7], %s918_s4  ;;  %s222_s8 = sshll.u32 %s220_s19, 4  ;;  %s223_s8 = int_to_ptr.hbm [resolvable:$true] %s222_s8 }
  0x23   : > { %p1103_p6 = pnand %p1102_p1, %p90_p9  ;;  %s224_s26 = sshll.u32 %s216_s25, 4  ;;  %s225_s26 = int_to_ptr.vmem [resolvable:$true] %s224_s26 }
  0x24   : > { %s171_s27 = sshll.u32 %s1713_s0, 4  ;;  %s1359_s0 = smov 16   ;;  %s172_s27 = int_to_ptr.hbm [resolvable:$true] %s171_s27 }
  0x25   : > { %s1715_s1 = smov 256   ;;  %233 = sbr.rel (%p1486_p5) target bundleno = 344 (0x158), region = 32 }
  0x26   : > { %1105 = dma.hbm_to_vmem [thread:$0]  (!%p1103_p6), %s172_s27, 4096, %s174_s30, [#allocation3], %s1715_s1, %s1715_s1, %s1359_s0  }
  0x27   : > { %1112 = dma.hbm_to_vmem [thread:$0]  (!%p1446_p7), %s223_s8, 32, %s225_s26, %s1450_s7  }
  0x2a   : > { %1320 = dma.done.wait (%p90_p9), [#allocation3], 4096  }
  0x2b   : > { %1322 = vsyncadd (%p90_p9), [#allocation3], 4294963200  ;;  %s240_s23 = sand.u32 1, %s1457_s11   ;;  %s1513_s29 = sand.u32 1, %s1337_s13  }
  0x2c   : > { %s922_s0 = sshll.u32 %s1513_s29, 8  ;;  %s241_s1 = scalar_lea.sflag [#allocation6], %s240_s23 }
  0x2d   : > { %s1518_s6 = scalar_lea.vmem [#allocation5], %s922_s0 }
  0x2e   : > { %1324 = dma.done.wait (%p1466_p12), %s241_s1, 4128  }
  0x2f   : > { %1326 = vsyncadd (%p1466_p12), %s241_s1, 4294963168  ;;  %v983_v0 = vld [vmem:[%s1518_s6 + $0x70] sm:$0xf]  ;;  %v1074_v1 = vld [vmem:[%s1518_s6 + $0x74] sm:$0xf0]  ;;  %s923_s7 = sshll.u32 %s1513_s29, 1 }
  0x30   : > { %v1047_v2 = vld [vmem:[%s1518_s6 + $0xf0] sm:$0xf]  ;;  %v984_v3 = vor.u32 %v1074_v1, %v983_v0  ;;  %v1090_v4 = vld [vmem:[%s1518_s6 + $0xf4] sm:$0xf0]  ;;  %v1073_v5 = vld [vmem:[%s1518_s6 + $0x74] sm:$0xf] }
  0x31   : > { %v985_v6 = vld [vmem:[%s1518_s6 + $0x78] sm:$0xf0]  ;;  %v1048_v7 = vor.u32 %v1090_v4, %v1047_v2  ;;  %v1089_v9 = vld [vmem:[%s1518_s6 + $0xf4] sm:$0xf]  ;;  %v975_v11 = vld [vmem:[%s1518_s6 + $0x60] sm:$0xf] }
  0x32   : > { %v988_v8 = vor.u32 %v1073_v5, %v985_v6  ;;  %v1049_v10 = vld [vmem:[%s1518_s6 + $0xf8] sm:$0xf0]  ;;  %536 = vmatpush.bf16.msra.mxu0 %v984_v3  ;;  %v1072_v13 = vld [vmem:[%s1518_s6 + $0x64] sm:$0xf0]  ;;  %v1039_v14 = vld [vmem:[%s1518_s6 + $0xe0] sm:$0xf] }
  0x33   : > { %v1052_v12 = vor.u32 %v1089_v9, %v1049_v10  ;;  %v1088_v15 = vld [vmem:[%s1518_s6 + $0xe4] sm:$0xf0]  ;;  %585 = vmatpush.bf16.msra.mxu1 %v1048_v7  ;;  %v976_v16 = vor.u32 %v1072_v13, %v975_v11  ;;  %v1071_v18 = vld [vmem:[%s1518_s6 + $0x64] sm:$0xf]  ;;  %v977_v19 = vld [vmem:[%s1518_s6 + $0x68] sm:$0xf0] }
  0x34   : > { %634 = vmatpush.bf16.msra.mxu2 %v988_v8  ;;  %v1040_v17 = vor.u32 %v1088_v15, %v1039_v14  ;;  %v1087_v20 = vld [vmem:[%s1518_s6 + $0xe4] sm:$0xf]  ;;  %v980_v21 = vor.u32 %v1071_v18, %v977_v19  ;;  %v1041_v22 = vld [vmem:[%s1518_s6 + $0xe8] sm:$0xf0]  ;;  %v967_v23 = vld [vmem:[%s1518_s6 + $0x50] sm:$0xf] }
  0x35   : > { %683 = vmatpush.bf16.msra.mxu3 %v1052_v12  ;;  %v1070_v24 = vld [vmem:[%s1518_s6 + $0x54] sm:$0xf0]  ;;  %v1044_v25 = vor.u32 %v1087_v20, %v1041_v22  ;;  %v1031_v26 = vld [vmem:[%s1518_s6 + $0xd0] sm:$0xf]  ;;  %v1069_v28 = vld [vmem:[%s1518_s6 + $0x54] sm:$0xf] }
  0x36   : > { %v1086_v27 = vld [vmem:[%s1518_s6 + $0xd4] sm:$0xf0]  ;;  %537 = vmatpush.bf16.msra.mxu0 %v976_v16  ;;  %v968_v29 = vor.u32 %v1070_v24, %v967_v23  ;;  %v969_v30 = vld [vmem:[%s1518_s6 + $0x58] sm:$0xf0]  ;;  %v1085_v31 = vld [vmem:[%s1518_s6 + $0xd4] sm:$0xf] }
  0x37   : > { %v1033_v32 = vld [vmem:[%s1518_s6 + $0xd8] sm:$0xf0]  ;;  %586 = vmatpush.bf16.msra.mxu1 %v1040_v17  ;;  %v1032_v33 = vor.u32 %v1086_v27, %v1031_v26  ;;  %v972_v34 = vor.u32 %v1069_v28, %v969_v30  ;;  %v959_v35 = vld [vmem:[%s1518_s6 + $0x40] sm:$0xf]  ;;  %v1068_v36 = vld [vmem:[%s1518_s6 + $0x44] sm:$0xf0] }
  0x38   : > { %635 = vmatpush.bf16.msra.mxu2 %v980_v21  ;;  %v1023_v37 = vld [vmem:[%s1518_s6 + $0xc0] sm:$0xf]  ;;  %v1036_v38 = vor.u32 %v1085_v31, %v1033_v32  ;;  %v1084_v39 = vld [vmem:[%s1518_s6 + $0xc4] sm:$0xf0]  ;;  %v1067_v40 = vld [vmem:[%s1518_s6 + $0x44] sm:$0xf]  ;;  %v960_v44 = vor.u32 %v1068_v36, %v959_v35 }
  0x39   : > { %684 = vmatpush.bf16.msra.mxu3 %v1044_v25  ;;  %v961_v41 = vld [vmem:[%s1518_s6 + $0x48] sm:$0xf0]  ;;  %v1083_v42 = vld [vmem:[%s1518_s6 + $0xc4] sm:$0xf]  ;;  %v1024_v45 = vor.u32 %v1084_v39, %v1023_v37  ;;  %v951_v47 = vld [vmem:[%s1518_s6 + $0x30] sm:$0xf] }
  0x3a   : > { %v1025_v43 = vld [vmem:[%s1518_s6 + $0xc8] sm:$0xf0]  ;;  %538 = vmatpush.bf16.msra.mxu0 %v968_v29  ;;  %v964_v46 = vor.u32 %v1067_v40, %v961_v41  ;;  %v1066_v48 = vld [vmem:[%s1518_s6 + $0x34] sm:$0xf0]  ;;  %v1015_v49 = vld [vmem:[%s1518_s6 + $0xb0] sm:$0xf] }
  0x3b   : > { %587 = vmatpush.bf16.msra.mxu1 %v1032_v33  ;;  %v1028_v50 = vor.u32 %v1083_v42, %v1025_v43  ;;  %v1082_v51 = vld [vmem:[%s1518_s6 + $0xb4] sm:$0xf0]  ;;  %v1065_v52 = vld [vmem:[%s1518_s6 + $0x34] sm:$0xf]  ;;  %v953_v53 = vld [vmem:[%s1518_s6 + $0x38] sm:$0xf0]  ;;  %v952_v56 = vor.u32 %v1066_v48, %v951_v47 }
  0x3c   : > { %636 = vmatpush.bf16.msra.mxu2 %v972_v34  ;;  %v1081_v54 = vld [vmem:[%s1518_s6 + $0xb4] sm:$0xf]  ;;  %v1017_v55 = vld [vmem:[%s1518_s6 + $0xb8] sm:$0xf0]  ;;  %v1016_v57 = vor.u32 %v1082_v51, %v1015_v49  ;;  %v956_v58 = vor.u32 %v1065_v52, %v953_v53  ;;  %v943_v59 = vld [vmem:[%s1518_s6 + $0x20] sm:$0xf] }
  0x3d   : > { %685 = vmatpush.bf16.msra.mxu3 %v1036_v38  ;;  %v1064_v60 = vld [vmem:[%s1518_s6 + $0x24] sm:$0xf0]  ;;  %v1007_v61 = vld [vmem:[%s1518_s6 + $0xa0] sm:$0xf]  ;;  %v1020_v62 = vor.u32 %v1081_v54, %v1017_v55  ;;  %v1063_v0 = vld [vmem:[%s1518_s6 + $0x24] sm:$0xf] }
  0x3e   : > { %539 = vmatpush.bf16.msra.mxu0 %v960_v44  ;;  %v1080_v63 = vld [vmem:[%s1518_s6 + $0xa4] sm:$0xf0]  ;;  %v945_v1 = vld [vmem:[%s1518_s6 + $0x28] sm:$0xf0]  ;;  %v1079_v2 = vld [vmem:[%s1518_s6 + $0xa4] sm:$0xf]  ;;  %v944_v4 = vor.u32 %v1064_v60, %v943_v59 }
  0x3f   : > { %588 = vmatpush.bf16.msra.mxu1 %v1024_v45  ;;  %v1009_v3 = vld [vmem:[%s1518_s6 + $0xa8] sm:$0xf0]  ;;  %v1008_v5 = vor.u32 %v1080_v63, %v1007_v61  ;;  %v948_v6 = vor.u32 %v1063_v0, %v945_v1  ;;  %v935_v7 = vld [vmem:[%s1518_s6 + $0x10] sm:$0xf]  ;;  %v1062_v8 = vld [vmem:[%s1518_s6 + $0x14] sm:$0xf0] }
  0x40   : > { %637 = vmatpush.bf16.msra.mxu2 %v964_v46  ;;  %v999_v9 = vld [vmem:[%s1518_s6 + $0x90] sm:$0xf]  ;;  %v1012_v10 = vor.u32 %v1079_v2, %v1009_v3  ;;  %v1078_v11 = vld [vmem:[%s1518_s6 + $0x94] sm:$0xf0]  ;;  %v1061_v12 = vld [vmem:[%s1518_s6 + $0x14] sm:$0xf]  ;;  %v936_v16 = vor.u32 %v1062_v8, %v935_v7 }
  0x41   : > { %686 = vmatpush.bf16.msra.mxu3 %v1028_v50  ;;  %v937_v13 = vld [vmem:[%s1518_s6 + $0x18] sm:$0xf0]  ;;  %v1077_v14 = vld [vmem:[%s1518_s6 + $0x94] sm:$0xf]  ;;  %v1000_v17 = vor.u32 %v1078_v11, %v999_v9  ;;  %v927_v19 = vld [vmem:[%s1518_s6] sm:$0xf] }
  0x42   : > { %540 = vmatpush.bf16.msra.mxu0 %v952_v56  ;;  %v1001_v15 = vld [vmem:[%s1518_s6 + $0x98] sm:$0xf0]  ;;  %v940_v18 = vor.u32 %v1061_v12, %v937_v13  ;;  %v1060_v20 = vld [vmem:[%s1518_s6 + $0x4] sm:$0xf0]  ;;  %v991_v21 = vld [vmem:[%s1518_s6 + $0x80] sm:$0xf] }
  0x43   : > { %589 = vmatpush.bf16.msra.mxu1 %v1016_v57  ;;  %v1004_v22 = vor.u32 %v1077_v14, %v1001_v15  ;;  %v1076_v23 = vld [vmem:[%s1518_s6 + $0x84] sm:$0xf0]  ;;  %v1059_v24 = vld [vmem:[%s1518_s6 + $0x4] sm:$0xf]  ;;  %v929_v25 = vld [vmem:[%s1518_s6 + $0x8] sm:$0xf0]  ;;  %v928_v28 = vor.u32 %v1060_v20, %v927_v19 }
  0x44   : > { %638 = vmatpush.bf16.msra.mxu2 %v956_v58  ;;  %v1075_v26 = vld [vmem:[%s1518_s6 + $0x84] sm:$0xf]  ;;  %v993_v27 = vld [vmem:[%s1518_s6 + $0x88] sm:$0xf0]  ;;  %v292_v30 = vld [vmem:[#allocation2 + $0x10] sm:$0xff]  ;;  %v992_v31 = vor.u32 %v1076_v23, %v991_v21  ;;  %v932_v32 = vor.u32 %v1059_v24, %v929_v25  ;;  %s254_s8 = scalar_lea.vmem [#allocation7], %s923_s7 }
  0x45   : > { %687 = vmatpush.bf16.msra.mxu3 %v1020_v62  ;;  %v290_v29 = vld [vmem:[#allocation2] sm:$0xff]  ;;  %v291_v33 = vld [vmem:[#allocation2 + $0x8] sm:$0xff]  ;;  %v293_v34 = vld [vmem:[#allocation2 + $0x18] sm:$0xff]  ;;  %v996_v35 = vor.u32 %v1075_v26, %v993_v27  ;;  %s1596_s11 = scalar_lea.vmem [#allocation8], %s922_s0  ;;  %s1091_s20 = sshll.u32 %s1345_s15, 4 }
  0x46   : > { %541 = vmatpush.bf16.msra.mxu0 %v944_v4  ;;  %v322_v36 = vpack.c.bf16 %v292_v30, %v290_v29  ;;  %v323_v37 = vpack.c.bf16 %v293_v34, %v291_v33  ;;  %v294_v38 = vld [vmem:[#allocation2 + $0x20] sm:$0xff]  ;;  %v296_v39 = vld [vmem:[#allocation2 + $0x30] sm:$0xff]  ;;  %v295_v40 = vld [vmem:[#allocation2 + $0x28] sm:$0xff]  ;;  %s779_s30 = scalar_lea.hbm %s1703_s3, %s1091_s20  ;;  %s780_s4 = sshll.u32 %s1596_s11, 4  ;;  %s781_s4 = int_to_ptr.vmem [resolvable:$true] %s780_s4 }
  0x47   : > { %590 = vmatpush.bf16.msra.mxu1 %v1008_v5  ;;  %v297_v41 = vld [vmem:[#allocation2 + $0x38] sm:$0xff]  ;;  %v324_v42 = vpack.c.bf16 %v296_v39, %v294_v38  ;;  %v298_v44 = vld [vmem:[#allocation2 + $0x40] sm:$0xff]  ;;  %v300_v45 = vld [vmem:[#allocation2 + $0x50] sm:$0xff]  ;;  %s782_s5 = sshll.u32 %s779_s30, 4  ;;  %s765_s15 = scalar_lea.sflag [#allocation4], %s1513_s29  ;;  %s783_s5 = int_to_ptr.hbm [resolvable:$true] %s782_s5 }
  0x48   : > { %639 = vmatpush.bf16.msra.mxu2 %v948_v6  ;;  %v325_v43 = vpack.c.bf16 %v297_v41, %v295_v40  ;;  %v299_v46 = vld [vmem:[#allocation2 + $0x48] sm:$0xff]  ;;  %v301_v47 = vld [vmem:[#allocation2 + $0x58] sm:$0xff]  ;;  %v326_v48 = vpack.c.bf16 %v300_v45, %v298_v44  ;;  %v302_v50 = vld [vmem:[#allocation2 + $0x60] sm:$0xff]  ;;  %s1281_s9 = sshra.s32 %s783_s5, 4  ;;  %s1287_s26 = scalar_lea.hbm %s1703_s3, 512  ;;  %s1282_s9 = int_to_ptr.hbm [resolvable:$true] %s1281_s9 }
  0x49   : > { %688 = vmatpush.bf16.msra.mxu3 %v1012_v10  ;;  %v327_v49 = vpack.c.bf16 %v301_v47, %v299_v46  ;;  %v304_v51 = vld [vmem:[#allocation2 + $0x70] sm:$0xff]  ;;  %v303_v52 = vld [vmem:[#allocation2 + $0x68] sm:$0xff]  ;;  %v305_v53 = vld [vmem:[#allocation2 + $0x78] sm:$0xff]  ;;  %s1283_s10 = scalar_lea.hbm %s1282_s9, 256  ;;  %p1288_p10 = scmp.lt.s32.totalorder %s1282_s9, %s1703_s3 }
  0x4a   : > { %542 = vmatpush.bf16.msra.mxu0 %v936_v16  ;;  %v328_v54 = vpack.c.bf16 %v304_v51, %v302_v50  ;;  %v329_v55 = vpack.c.bf16 %v305_v53, %v303_v52  ;;  %v306_v56 = vld [vmem:[#allocation2 + $0x80] sm:$0xff]  ;;  %v308_v57 = vld [vmem:[#allocation2 + $0x90] sm:$0xff]  ;;  %v307_v58 = vld [vmem:[#allocation2 + $0x88] sm:$0xff]  ;;  %p1284_p7 = scmp.ne.s32.totalorder %s1282_s9, %s1283_s10  ;;  %p1289_p11 = scmp.lt.s32.totalorder %s1287_s26, %s1283_s10 }
  0x4b   : > { %591 = vmatpush.bf16.msra.mxu1 %v1000_v17  ;;  %v309_v59 = vld [vmem:[#allocation2 + $0x98] sm:$0xff]  ;;  %v330_v60 = vpack.c.bf16 %v308_v57, %v306_v56  ;;  %v310_v62 = vld [vmem:[#allocation2 + $0xa0] sm:$0xff]  ;;  %v312_v63 = vld [vmem:[#allocation2 + $0xb0] sm:$0xff] }
  0x4c   : > { %640 = vmatpush.bf16.msra.mxu2 %v940_v18  ;;  %v331_v61 = vpack.c.bf16 %v309_v59, %v307_v58  ;;  %v311_v0 = vld [vmem:[#allocation2 + $0xa8] sm:$0xff]  ;;  %v313_v1 = vld [vmem:[#allocation2 + $0xb8] sm:$0xff]  ;;  %v332_v2 = vpack.c.bf16 %v312_v63, %v310_v62  ;;  %v314_v4 = vld [vmem:[#allocation2 + $0xc0] sm:$0xff]  ;;  %p1285_p8 = pnand %p1284_p7, %p1474_p0  ;;  %p1290_p12 = por %p1289_p11, %p1288_p10 }
  0x4d   : > { %689 = vmatpush.bf16.msra.mxu3 %v1004_v22  ;;  %v333_v3 = vpack.c.bf16 %v313_v1, %v311_v0  ;;  %v316_v5 = vld [vmem:[#allocation2 + $0xd0] sm:$0xff]  ;;  %v315_v6 = vld [vmem:[#allocation2 + $0xc8] sm:$0xff]  ;;  %v317_v7 = vld [vmem:[#allocation2 + $0xd8] sm:$0xff] }
  0x4e   : > { %543 = vmatpush.bf16.msra.mxu0 %v928_v28  ;;  %v334_v8 = vpack.c.bf16 %v316_v5, %v314_v4  ;;  %v335_v9 = vpack.c.bf16 %v317_v7, %v315_v6  ;;  %v318_v10 = vld [vmem:[#allocation2 + $0xe0] sm:$0xff]  ;;  %v320_v11 = vld [vmem:[#allocation2 + $0xf0] sm:$0xff]  ;;  %v319_v12 = vld [vmem:[#allocation2 + $0xe8] sm:$0xff]  ;;  %p1286_p9 = pneg %p1285_p8 }
  0x4f   : > { %592 = vmatpush.bf16.msra.mxu1 %v992_v31  ;;  %v321_v13 = vld [vmem:[#allocation2 + $0xf8] sm:$0xff]  ;;  %v336_v14 = vpack.c.bf16 %v320_v11, %v318_v10  ;;  %v370_v16 = vld [vmem:[%s254_s8] sm:$0x3] }
  0x50   : > { %641 = vmatpush.bf16.msra.mxu2 %v932_v32  ;;  %v337_v15 = vpack.c.bf16 %v321_v13, %v319_v12  ;;  %v1589_v17 = vperm.slane %v370_v16, 0  ;;  %v1592_v22 = vperm.slane %v370_v16, 1  ;;  %p1291_p13 = pnand %p1290_p12, %p1286_p9 }
  0x51   : > { %690 = vmatpush.bf16.msra.mxu3 %v996_v35  ;;  %544 = vmatmul.bf16.vlgmr.msra.gmra.mxu0 %v322_v36 }
  0x52   : > { %593 = vmatmul.bf16.vlgmr.msra.gmra.mxu1 %v323_v37 }
  0x53   : > { %642 = vmatmul.bf16.vlgmr.msra.gmra.mxu2 %v322_v36 }
  0x54   : > { %691 = vmatmul.bf16.vlgmr.msra.gmra.mxu3 %v323_v37 }
  0x61   : > { %549 = vmatmul.bf16.gmra.mxu0 %v324_v42 }
  0x62   : > { %598 = vmatmul.bf16.gmra.mxu1 %v325_v43 }
  0x63   : > { %647 = vmatmul.bf16.gmra.mxu2 %v324_v42 }
  0x64   : > { %696 = vmatmul.bf16.gmra.mxu3 %v325_v43 }
  0x71   : > { %554 = vmatmul.bf16.gmra.mxu0 %v326_v48 }
  0x72   : > { %603 = vmatmul.bf16.gmra.mxu1 %v327_v49 }
  0x73   : > { %652 = vmatmul.bf16.gmra.mxu2 %v326_v48 }
  0x74   : > { %701 = vmatmul.bf16.gmra.mxu3 %v327_v49 }
  0x81   : > { %559 = vmatmul.bf16.gmra.mxu0 %v328_v54 }
  0x82   : > { %608 = vmatmul.bf16.gmra.mxu1 %v329_v55 }
  0x83   : > { %657 = vmatmul.bf16.gmra.mxu2 %v328_v54 }
  0x84   : > { %706 = vmatmul.bf16.gmra.mxu3 %v329_v55 }
  0x91   : > { %564 = vmatmul.bf16.gmra.mxu0 %v330_v60 }
  0x92   : > { %613 = vmatmul.bf16.gmra.mxu1 %v331_v61 }
  0x93   : > { %662 = vmatmul.bf16.gmra.mxu2 %v330_v60 }
  0x94   : > { %711 = vmatmul.bf16.gmra.mxu3 %v331_v61 }
  0xa1   : > { %569 = vmatmul.bf16.gmra.mxu0 %v332_v2 }
  0xa2   : > { %618 = vmatmul.bf16.gmra.mxu1 %v333_v3 }
  0xa3   : > { %667 = vmatmul.bf16.gmra.mxu2 %v332_v2 }
  0xa4   : > { %716 = vmatmul.bf16.gmra.mxu3 %v333_v3 }
  0xb1   : > { %574 = vmatmul.bf16.gmra.mxu0 %v334_v8 }
  0xb2   : > { %623 = vmatmul.bf16.gmra.mxu1 %v335_v9 }
  0xb3   : > { %672 = vmatmul.bf16.gmra.mxu2 %v334_v8 }
  0xb4   : > { %721 = vmatmul.bf16.gmra.mxu3 %v335_v9 }
  0xc1   : > { %579 = vmatmul.bf16.gmra.mxu0 %v336_v14 }
  0xc2   : > { %628 = vmatmul.bf16.gmra.mxu1 %v337_v15 }
  0xc3   : > { %677 = vmatmul.bf16.gmra.mxu2 %v336_v14 }
  0xc4   : > { %726 = vmatmul.bf16.gmra.mxu3 %v337_v15 }
  0xce   : > { %v545_v18 = vpop.f32.mrf.mxu0 }
  0xcf   : > { %v546_v19 = vadd.f32 %v545_v18, %v1589_v17  ;;  %v594_v20 = vpop.f32.mrf.mxu1 }
  0xd1   : > { %v595_v21 = vadd.f32 %v594_v20, %v546_v19 }
  0xd3   : > { %732 = vst [vmem:[%s1596_s11] sm:$0xff] %v595_v21 }
  0xd6   : > { %v643_v23 = vpop.f32.mrf.mxu2  ;;  %v547_v26 = vpop.f32.mrf.mxu0 }
  0xd7   : > { %v644_v24 = vadd.f32 %v643_v23, %v1592_v22  ;;  %v692_v25 = vpop.f32.mrf.mxu3  ;;  %v548_v27 = vadd.f32 %v547_v26, %v1589_v17  ;;  %v596_v28 = vpop.f32.mrf.mxu1 }
  0xd9   : > { %v693_v29 = vadd.f32 %v692_v25, %v644_v24  ;;  %v597_v30 = vadd.f32 %v596_v28, %v548_v27 }
  0xdb   : > { %733 = vst [vmem:[%s1596_s11 + $0x8] sm:$0xff] %v693_v29 }
  0xdc   : > { %734 = vst [vmem:[%s1596_s11 + $0x10] sm:$0xff] %v597_v30 }
  0xde   : > { %v645_v31 = vpop.f32.mrf.mxu2  ;;  %v550_v34 = vpop.f32.mrf.mxu0 }
  0xdf   : > { %v646_v32 = vadd.f32 %v645_v31, %v1592_v22  ;;  %v694_v33 = vpop.f32.mrf.mxu3  ;;  %v551_v35 = vadd.f32 %v550_v34, %v1589_v17  ;;  %v599_v36 = vpop.f32.mrf.mxu1 }
  0xe1   : > { %v695_v37 = vadd.f32 %v694_v33, %v646_v32  ;;  %v600_v38 = vadd.f32 %v599_v36, %v551_v35 }
  0xe3   : > { %735 = vst [vmem:[%s1596_s11 + $0x18] sm:$0xff] %v695_v37 }
  0xe4   : > { %736 = vst [vmem:[%s1596_s11 + $0x20] sm:$0xff] %v600_v38 }
  0xe6   : > { %v648_v39 = vpop.f32.mrf.mxu2  ;;  %v552_v42 = vpop.f32.mrf.mxu0 }
  0xe7   : > { %v649_v40 = vadd.f32 %v648_v39, %v1592_v22  ;;  %v697_v41 = vpop.f32.mrf.mxu3  ;;  %v553_v43 = vadd.f32 %v552_v42, %v1589_v17  ;;  %v601_v44 = vpop.f32.mrf.mxu1 }
  0xe9   : > { %v698_v45 = vadd.f32 %v697_v41, %v649_v40  ;;  %v602_v46 = vadd.f32 %v601_v44, %v553_v43 }
  0xeb   : > { %737 = vst [vmem:[%s1596_s11 + $0x28] sm:$0xff] %v698_v45 }
  0xec   : > { %738 = vst [vmem:[%s1596_s11 + $0x30] sm:$0xff] %v602_v46 }
  0xee   : > { %v650_v47 = vpop.f32.mrf.mxu2  ;;  %v555_v50 = vpop.f32.mrf.mxu0 }
  0xef   : > { %v651_v48 = vadd.f32 %v650_v47, %v1592_v22  ;;  %v699_v49 = vpop.f32.mrf.mxu3  ;;  %v556_v51 = vadd.f32 %v555_v50, %v1589_v17  ;;  %v604_v52 = vpop.f32.mrf.mxu1 }
  0xf1   : > { %v700_v53 = vadd.f32 %v699_v49, %v651_v48  ;;  %v605_v54 = vadd.f32 %v604_v52, %v556_v51 }
  0xf3   : > { %739 = vst [vmem:[%s1596_s11 + $0x38] sm:$0xff] %v700_v53 }
  0xf4   : > { %740 = vst [vmem:[%s1596_s11 + $0x40] sm:$0xff] %v605_v54 }
  0xf6   : > { %v653_v55 = vpop.f32.mrf.mxu2  ;;  %v557_v58 = vpop.f32.mrf.mxu0 }
  0xf7   : > { %v654_v56 = vadd.f32 %v653_v55, %v1592_v22  ;;  %v702_v57 = vpop.f32.mrf.mxu3  ;;  %v558_v59 = vadd.f32 %v557_v58, %v1589_v17  ;;  %v606_v60 = vpop.f32.mrf.mxu1 }
  0xf9   : > { %v703_v61 = vadd.f32 %v702_v57, %v654_v56  ;;  %v607_v62 = vadd.f32 %v606_v60, %v558_v59 }
  0xfb   : > { %741 = vst [vmem:[%s1596_s11 + $0x48] sm:$0xff] %v703_v61 }
  0xfc   : > { %742 = vst [vmem:[%s1596_s11 + $0x50] sm:$0xff] %v607_v62 }
  0xfe   : > { %v655_v63 = vpop.f32.mrf.mxu2  ;;  %v560_v2 = vpop.f32.mrf.mxu0 }
  0xff   : > { %v656_v0 = vadd.f32 %v655_v63, %v1592_v22  ;;  %v704_v1 = vpop.f32.mrf.mxu3  ;;  %v561_v3 = vadd.f32 %v560_v2, %v1589_v17  ;;  %v609_v4 = vpop.f32.mrf.mxu1 }
 0x101   : > { %v705_v5 = vadd.f32 %v704_v1, %v656_v0  ;;  %v610_v6 = vadd.f32 %v609_v4, %v561_v3 }
 0x103   : > { %743 = vst [vmem:[%s1596_s11 + $0x58] sm:$0xff] %v705_v5 }
 0x104   : > { %744 = vst [vmem:[%s1596_s11 + $0x60] sm:$0xff] %v610_v6 }
 0x106   : > { %v658_v7 = vpop.f32.mrf.mxu2  ;;  %v562_v10 = vpop.f32.mrf.mxu0 }
 0x107   : > { %v659_v8 = vadd.f32 %v658_v7, %v1592_v22  ;;  %v707_v9 = vpop.f32.mrf.mxu3  ;;  %v563_v11 = vadd.f32 %v562_v10, %v1589_v17  ;;  %v611_v12 = vpop.f32.mrf.mxu1 }
 0x109   : > { %v708_v13 = vadd.f32 %v707_v9, %v659_v8  ;;  %v612_v14 = vadd.f32 %v611_v12, %v563_v11 }
 0x10b   : > { %745 = vst [vmem:[%s1596_s11 + $0x68] sm:$0xff] %v708_v13 }
 0x10c   : > { %746 = vst [vmem:[%s1596_s11 + $0x70] sm:$0xff] %v612_v14 }
 0x10e   : > { %v660_v15 = vpop.f32.mrf.mxu2  ;;  %v565_v19 = vpop.f32.mrf.mxu0 }
 0x10f   : > { %v661_v16 = vadd.f32 %v660_v15, %v1592_v22  ;;  %v709_v18 = vpop.f32.mrf.mxu3  ;;  %v566_v20 = vadd.f32 %v565_v19, %v1589_v17  ;;  %v614_v21 = vpop.f32.mrf.mxu1 }
 0x111   : > { %v710_v23 = vadd.f32 %v709_v18, %v661_v16  ;;  %v615_v24 = vadd.f32 %v614_v21, %v566_v20 }
 0x113   : > { %747 = vst [vmem:[%s1596_s11 + $0x78] sm:$0xff] %v710_v23 }
 0x114   : > { %748 = vst [vmem:[%s1596_s11 + $0x80] sm:$0xff] %v615_v24 }
 0x116   : > { %v663_v25 = vpop.f32.mrf.mxu2  ;;  %v567_v28 = vpop.f32.mrf.mxu0 }
 0x117   : > { %v664_v26 = vadd.f32 %v663_v25, %v1592_v22  ;;  %v712_v27 = vpop.f32.mrf.mxu3  ;;  %v568_v29 = vadd.f32 %v567_v28, %v1589_v17  ;;  %v616_v30 = vpop.f32.mrf.mxu1 }
 0x119   : > { %v713_v31 = vadd.f32 %v712_v27, %v664_v26  ;;  %v617_v32 = vadd.f32 %v616_v30, %v568_v29 }
 0x11b   : > { %749 = vst [vmem:[%s1596_s11 + $0x88] sm:$0xff] %v713_v31 }
 0x11c   : > { %750 = vst [vmem:[%s1596_s11 + $0x90] sm:$0xff] %v617_v32 }
 0x11e   : > { %v665_v33 = vpop.f32.mrf.mxu2  ;;  %v570_v36 = vpop.f32.mrf.mxu0 }
 0x11f   : > { %v666_v34 = vadd.f32 %v665_v33, %v1592_v22  ;;  %v714_v35 = vpop.f32.mrf.mxu3  ;;  %v571_v37 = vadd.f32 %v570_v36, %v1589_v17  ;;  %v619_v38 = vpop.f32.mrf.mxu1 }
 0x121   : > { %v715_v39 = vadd.f32 %v714_v35, %v666_v34  ;;  %v620_v40 = vadd.f32 %v619_v38, %v571_v37 }
 0x123   : > { %751 = vst [vmem:[%s1596_s11 + $0x98] sm:$0xff] %v715_v39 }
 0x124   : > { %752 = vst [vmem:[%s1596_s11 + $0xa0] sm:$0xff] %v620_v40 }
 0x126   : > { %v668_v41 = vpop.f32.mrf.mxu2  ;;  %v572_v44 = vpop.f32.mrf.mxu0 }
 0x127   : > { %v669_v42 = vadd.f32 %v668_v41, %v1592_v22  ;;  %v717_v43 = vpop.f32.mrf.mxu3  ;;  %v573_v45 = vadd.f32 %v572_v44, %v1589_v17  ;;  %v621_v46 = vpop.f32.mrf.mxu1 }
 0x129   : > { %v718_v47 = vadd.f32 %v717_v43, %v669_v42  ;;  %v622_v48 = vadd.f32 %v621_v46, %v573_v45 }
 0x12b   : > { %753 = vst [vmem:[%s1596_s11 + $0xa8] sm:$0xff] %v718_v47 }
 0x12c   : > { %754 = vst [vmem:[%s1596_s11 + $0xb0] sm:$0xff] %v622_v48 }
 0x12e   : > { %v670_v49 = vpop.f32.mrf.mxu2  ;;  %v575_v52 = vpop.f32.mrf.mxu0 }
 0x12f   : > { %v671_v50 = vadd.f32 %v670_v49, %v1592_v22  ;;  %v719_v51 = vpop.f32.mrf.mxu3  ;;  %v576_v53 = vadd.f32 %v575_v52, %v1589_v17  ;;  %v624_v54 = vpop.f32.mrf.mxu1 }
 0x131   : > { %v720_v55 = vadd.f32 %v719_v51, %v671_v50  ;;  %v625_v56 = vadd.f32 %v624_v54, %v576_v53 }
 0x133   : > { %755 = vst [vmem:[%s1596_s11 + $0xb8] sm:$0xff] %v720_v55 }
 0x134   : > { %756 = vst [vmem:[%s1596_s11 + $0xc0] sm:$0xff] %v625_v56 }
 0x136   : > { %v673_v57 = vpop.f32.mrf.mxu2  ;;  %v577_v60 = vpop.f32.mrf.mxu0 }
 0x137   : > { %v674_v58 = vadd.f32 %v673_v57, %v1592_v22  ;;  %v722_v59 = vpop.f32.mrf.mxu3  ;;  %v578_v61 = vadd.f32 %v577_v60, %v1589_v17  ;;  %v626_v62 = vpop.f32.mrf.mxu1 }
 0x139   : > { %v723_v63 = vadd.f32 %v722_v59, %v674_v58  ;;  %v627_v0 = vadd.f32 %v626_v62, %v578_v61 }
 0x13b   : > { %757 = vst [vmem:[%s1596_s11 + $0xc8] sm:$0xff] %v723_v63 }
 0x13c   : > { %758 = vst [vmem:[%s1596_s11 + $0xd0] sm:$0xff] %v627_v0 }
 0x13e   : > { %v675_v1 = vpop.f32.mrf.mxu2  ;;  %v580_v4 = vpop.f32.mrf.mxu0 }
 0x13f   : > { %v676_v2 = vadd.f32 %v675_v1, %v1592_v22  ;;  %v724_v3 = vpop.f32.mrf.mxu3  ;;  %v581_v5 = vadd.f32 %v580_v4, %v1589_v17  ;;  %v629_v6 = vpop.f32.mrf.mxu1 }
 0x141   : > { %v725_v7 = vadd.f32 %v724_v3, %v676_v2  ;;  %v630_v8 = vadd.f32 %v629_v6, %v581_v5 }
 0x143   : > { %759 = vst [vmem:[%s1596_s11 + $0xd8] sm:$0xff] %v725_v7 }
 0x144   : > { %760 = vst [vmem:[%s1596_s11 + $0xe0] sm:$0xff] %v630_v8 }
 0x146   : > { %v678_v9 = vpop.f32.mrf.mxu2  ;;  %v582_v12 = vpop.f32.mrf.mxu0 }
 0x147   : > { %v679_v10 = vadd.f32 %v678_v9, %v1592_v22  ;;  %v727_v11 = vpop.f32.mrf.mxu3  ;;  %v583_v13 = vadd.f32 %v582_v12, %v1589_v17  ;;  %v631_v15 = vpop.f32.mrf.mxu1 }
 0x149   : > { %v728_v14 = vadd.f32 %v727_v11, %v679_v10  ;;  %v632_v16 = vadd.f32 %v631_v15, %v583_v13 }
 0x14b   : > { %761 = vst [vmem:[%s1596_s11 + $0xe8] sm:$0xff] %v728_v14 }
 0x14c   : > { %762 = vst [vmem:[%s1596_s11 + $0xf0] sm:$0xff] %v632_v16 }
 0x14e   : > { %v680_v18 = vpop.f32.mrf.mxu2 }
 0x14f   : > { %v681_v19 = vadd.f32 %v680_v18, %v1592_v22  ;;  %v729_v20 = vpop.f32.mrf.mxu3 }
 0x151   : > { %v730_v17 = vadd.f32 %v729_v20, %v681_v19 }
 0x153   : > { %763 = vst [vmem:[%s1596_s11 + $0xf8] sm:$0xff] %v730_v17 }
 0x154   : > { %1294 = shalt.err (!%p1291_p13)
}
 0x155   : > { %s1360_s29 = smov 256   ;;  %s1361_s1 = smov 512  }
 0x156   : > { %s1362_s6 = smov 16  }
 0x157   : > { %1100 = dma.vmem_to_hbm [thread:$0]  (%p1474_p0), %s781_s4, 4096, %s783_s5, %s765_s15, %s1360_s29, %s1361_s1, %s1362_s6  }
 0x158 PF: > { %s797_s7 = sand.u32 1, %s1333_s12   ;;  %p1114_p3 = pnand %p914_p4, %p1478_p2 }
 0x159   : > { %s798_s8 = scalar_lea.sflag [#allocation4], %s797_s7 }
 0x15a   : > { %p1115_p5 = pneg %p1114_p3 }
 0x15c   : > { %1328 = dma.done.wait (%p1115_p5), %s798_s8, 4096  }
 0x15d   : > { %1330 = vsyncadd (%p1115_p5), %s798_s8, 4294963200  ;;  %s20_s17 = sadd.s32 1, %s1353_s17   ;;  %s1716_s12 = smov %s1337_s13 }
 0x15e   : > { %p17_p1 = scmp.ge.s32.totalorder %s20_s17, 4   ;;  %s1717_s13 = smov %s1341_s14 }
 0x15f   : > { %s1718_s14 = smov %s1434_s24  ;;  %s1719_s15 = smov %s1349_s16 }
 0x160   : > { %s1720_s16 = smov %s1722_s18  ;;  %19 = sbr.rel (!%p17_p1) target bundleno = 10 (0xa), region = 94 }
 0x165   :  { %804 = vsyncpa [#allocation3], 1 }
 0x166   :  { %806 = vsyncpa [#allocation3 + $0x1], 1 }
 0x167   :  { %807 = vsyncpa [#allocation6], 1 }
 0x168   :  { %809 = vsyncpa [#allocation6 + $0x1], 1 }
 0x169   :  { %810 = vsyncpa [#allocation4], 1 }
 0x16a   :  { %812 = vsyncpa [#allocation4 + $0x1], 1 }

</bundles_post_ra>
